<compile_context>
chip_gen: v7x
topology: tpu7x:2x2x1
jax: 0.10.0
libtpu: 0.0.40
codegen_flags: <defaults>
</compile_context>

<pallas_src>
import functools
import math

import jax
import jax.numpy as jnp
from jax import lax
from jax.experimental import pallas as pl
from jax.experimental.pallas import tpu as pltpu

LANES = 128
SUBLANES = 8


def _fold_block(p_ref, g_ref, rem):
    """Reduce the current (rows, 128) block to three (8, 128) partial sums.

    rem: number of valid elements in this block (traced scalar), or None for a
    fully in-bounds interior block (only the `g != 2` ignore mask applies).
    Work is done in small row chunks loaded straight from the refs so no
    (rows, 128) masked temporary is ever materialized in VMEM.
    """
    rows = p_ref.shape[0]
    chunk = math.gcd(rows, 64)            # multiple of 8 that divides `rows`
    nchunks = rows // chunk
    ngrp = chunk // SUBLANES

    if rem is not None:
        row_io = lax.broadcasted_iota(jnp.int32, (chunk, LANES), 0)
        lane_io = lax.broadcasted_iota(jnp.int32, (chunk, LANES), 1)
        local = row_io * LANES + lane_io  # element index within a chunk

    def fold(x):
        # (chunk,128) -> (8,128) with pure elementwise vreg adds (no XLU).
        return jnp.sum(x.reshape(ngrp, SUBLANES, LANES), axis=0)

    def body(c, carry):
        pg_acc, p_acc, g_acc = carry
        r0 = pl.multiple_of(c * chunk, chunk)
        p = p_ref[pl.ds(r0, chunk), :].astype(jnp.float32)
        g = g_ref[pl.ds(r0, chunk), :].astype(jnp.float32)
        m = g != 2.0                                  # ignore-label mask
        if rem is not None:
            m = m & (local < (rem - r0 * LANES))      # ragged-edge validity
        pm = jnp.where(m, p, 0.0)
        gm = jnp.where(m, g, 0.0)
        pgm = pm * gm                                 # == p*g*mask (m boolean)
        return (pg_acc + fold(pgm), p_acc + fold(pm), g_acc + fold(gm))

    zeros = jnp.zeros((SUBLANES, LANES), jnp.float32)
    return lax.fori_loop(0, nchunks, body, (zeros, zeros, zeros))


def _dice_partials_kernel(p_ref, g_ref, pg_out, p_out, g_out,
                          *, n_valid, steps_per_part, last_block):
    c = pl.program_id(0)   # partition (TensorCore split on v7x)
    i = pl.program_id(1)   # reduction step within this partition

    @pl.when(i == 0)
    def _():
        pg_out[...] = jnp.zeros_like(pg_out)
        p_out[...] = jnp.zeros_like(p_out)
        g_out[...] = jnp.zeros_like(g_out)

    rows = p_ref.shape[0]
    b = c * steps_per_part + i          # logical (unclamped) block index

    # Fast path: fully in-bounds interior block -> no iota validity mask.
    @pl.when(b < last_block)
    def _():
        pg, pp, gg = _fold_block(p_ref, g_ref, rem=None)
        pg_out[...] += pg[None]
        p_out[...] += pp[None]
        g_out[...] += gg[None]

    # Edge path: possibly-partial last block, or a clamped duplicate block
    # (b > last_block => rem <= 0 => contribution fully masked to zero).
    @pl.when(b >= last_block)
    def _():
        rem = n_valid - b * (rows * LANES)   # int32: fine for < 2**31 elements
        pg, pp, gg = _fold_block(p_ref, g_ref, rem=rem)
        pg_out[...] += pg[None]
        p_out[...] += pp[None]
        g_out[...] += gg[None]


def _default_num_partitions():
    """2 on v7x (2 TensorCores per chip); 1 on single-TC parts (v5e/v6e)."""
    try:
        kind = jax.devices()[0].device_kind.lower()
    except Exception:
        return 1
    return 2 if ("v7" in kind or "7x" in kind) else 1


def dice_loss(y_pred, y_true, *, target_block_rows=4096, num_partitions=None):
    """Pallas implementation of Dice_loss.forward(y_pred, y_true)."""
    p_flat = y_pred.reshape(-1)        # native dtype; cast happens in-kernel
    g_flat = y_true.reshape(-1)
    n = p_flat.shape[0]
    f32 = jnp.float32

    if num_partitions is None:
        num_partitions = _default_num_partitions()

    rows_total = n // LANES
    use_kernel = rows_total >= SUBLANES
    n_kernel = rows_total * LANES if use_kernel else 0

    tp_num = jnp.float32(0.0)
    s_p = jnp.float32(0.0)
    s_g = jnp.float32(0.0)

    if use_kernel:
        if n_kernel == n:
            p_main, g_main = p_flat, g_flat
        else:
            p_main = lax.slice(p_flat, (0,), (n_kernel,))
            g_main = lax.slice(g_flat, (0,), (n_kernel,))
        P = p_main.reshape(rows_total, LANES)
        G = g_main.reshape(rows_total, LANES)

        # Big lane-dense blocks (HBM-bound); block rows are a multiple of 8
        # sublanes and never exceed the array's row extent.
        block_rows = min(target_block_rows, (rows_total // SUBLANES) * SUBLANES)
        num_blocks = pl.cdiv(rows_total, block_rows)

        parts = num_partitions if num_blocks >= num_partitions else 1
        steps = pl.cdiv(num_blocks, parts)
        last_block = num_blocks - 1

        def in_map(c, i):
            # Clamp so the DMA never indexes past the last block; the kernel
            # fully masks the (logically out-of-range) duplicate contribution.
            return (jnp.minimum(c * steps + i, last_block), 0)

        def out_map(c, i):
            return (c, 0, 0)

        kernel = functools.partial(
            _dice_partials_kernel, n_valid=n_kernel,
            steps_per_part=steps, last_block=last_block)

        out_sds = jax.ShapeDtypeStruct((parts, SUBLANES, LANES), jnp.float32)
        out_spec = pl.BlockSpec((1, SUBLANES, LANES), out_map)

        # TODO(synk): if an xprof trace on v7x shows one TensorCore idle with
        # "parallel", switch the first grid axis to pltpu.CORE_PARALLEL.
        pg_part, p_part, g_part = pl.pallas_call(
            kernel,
            out_shape=(out_sds, out_sds, out_sds),
            grid_spec=pltpu.PrefetchScalarGridSpec(
                num_scalar_prefetch=0,
                grid=(parts, steps),
                in_specs=[
                    pl.BlockSpec((block_rows, LANES), in_map),
                    pl.BlockSpec((block_rows, LANES), in_map),
                ],
                out_specs=(out_spec, out_spec, out_spec),
            ),
            compiler_params=pltpu.CompilerParams(
                dimension_semantics=("parallel", "arbitrary")),
        )(P, G)

        tp_num = tp_num + jnp.sum(pg_part)
        s_p = s_p + jnp.sum(p_part)
        s_g = s_g + jnp.sum(g_part)

    if n_kernel < n:
        # Tiny ragged tail (<128 elems, or the whole array when n < 1024) in
        # plain JAX — avoids a full-array HBM-copying jnp.pad.
        pt = lax.slice(p_flat, (n_kernel,), (n,)).astype(f32)
        gt = lax.slice(g_flat, (n_kernel,), (n,)).astype(f32)
        mt = gt != 2.0
        pmt = jnp.where(mt, pt, 0.0)
        gmt = jnp.where(mt, gt, 0.0)
        tp_num = tp_num + jnp.sum(pmt * gmt)
        s_p = s_p + jnp.sum(pmt)
        s_g = s_g + jnp.sum(gmt)

    # fp = sum(p0*(1-g0)*m) = s_p - tp ;  fn = sum((1-p0)*g0*m) = s_g - tp
    fp_num = s_p - tp_num
    fn_num = s_g - tp_num

    prec = (tp_num + 1.0) / (tp_num + fp_num + 1.0)
    rec = (tp_num + 1.0) / (tp_num + fn_num + 1.0)
    f1 = 2.0 * prec * rec / (prec + rec + 1e-8)
    return 1.0 - f1


def _dice_loss_ref(y_pred, y_true):
    """Pure-JAX reference mirroring the PyTorch forward."""
    p0 = y_pred
    g0 = y_true
    p1 = 1.0 - y_pred
    g1 = 1.0 - y_true
    m = (y_true != 2).astype(jnp.float32)
    tp = jnp.sum(p0 * g0 * m)
    fp = jnp.sum(p0 * g1 * m)
    fn = jnp.sum(p1 * g0 * m)
    prec = (tp + 1.0) / (tp + fp + 1.0)
    rec = (tp + 1.0) / (tp + fn + 1.0)
    f1 = 2.0 * prec * rec / (prec + rec + 1e-8)
    return 1.0 - f1


if __name__ == "__main__":
    key = jax.random.PRNGKey(0)
    k1, k2 = jax.random.split(key)
    # NCHW-shaped inputs, as the PyTorch module would receive.
    # NOTE: callers may pass y_pred as bf16 and y_true as int8 ({0,1,2}
    # labels) — the kernel casts in-kernel and is HBM-bound, so narrower
    # inputs are a direct ~2.6x speedup.  f32 here to match the reference.
    y_pred = jax.random.uniform(k1, (2, 4, 16, 16), dtype=jnp.float32)
    # y_true in {0, 1, 2}; value 2 marks ignored (masked) voxels.
    y_true = jax.random.randint(k2, (2, 4, 16, 16), 0, 3).astype(jnp.float32)

    loss = jax.block_until_ready(dice_loss(y_pred, y_true))
    ref = jax.block_until_ready(_dice_loss_ref(y_pred, y_true))
    assert jnp.allclose(loss, ref, rtol=1e-5, atol=1e-5), (loss, ref)
    print("KERNEL_OK")
</pallas_src>

<mosaic_0001>
module attributes {stable_mosaic.version = 11 : i64} {
  func.func @_dice_partials_kernel(%arg0: i32, %arg1: i32, %arg2: memref<16x128xf32, #tpu.memory_space<vmem>>, %arg3: memref<16x128xf32, #tpu.memory_space<vmem>>, %arg4: memref<1x8x128xf32, #tpu.memory_space<vmem>>, %arg5: memref<1x8x128xf32, #tpu.memory_space<vmem>>, %arg6: memref<1x8x128xf32, #tpu.memory_space<vmem>>) attributes {dimension_semantics = [#tpu.dimension_semantics<parallel>, #tpu.dimension_semantics<arbitrary>], iteration_bounds = array<i64: 1, 1>, scalar_prefetch = 0 : i64, scratch_operands = 0 : i64, tpu.core_type = #tpu.core_type<tc>, window_params = [{transform_indices = @transform_0, window_bounds = array<i64: 16, 128>}, {transform_indices = @transform_1, window_bounds = array<i64: 16, 128>}, {transform_indices = @transform_2, window_bounds = array<i64: 1, 8, 128>}, {transform_indices = @transform_3, window_bounds = array<i64: 1, 8, 128>}, {transform_indices = @transform_4, window_bounds = array<i64: 1, 8, 128>}]} {
    %c0_i32 = arith.constant 0 : i32
    %0 = arith.cmpi eq, %arg1, %c0_i32 : i32
    %1 = arith.extui %0 : i1 to i32
    %c0_i32_0 = arith.constant 0 : i32
    %2 = arith.cmpi ne, %1, %c0_i32_0 : i32
    scf.if %2 {
      %cst = arith.constant 0.000000e+00 : f32
      %11 = vector.broadcast %cst : f32 to vector<1x8x128xf32>
      %c0 = arith.constant 0 : index
      %c0_5 = arith.constant 0 : index
      %c0_6 = arith.constant 0 : index
      %12 = vector.load %arg4[%c0, %c0_5, %c0_6] : memref<1x8x128xf32, #tpu.memory_space<vmem>>, vector<1x8x128xf32>
      tpu.vector_store %arg4[%c0, %c0_5, %c0_6], %11 {strides = array<i32>} : memref<1x8x128xf32, #tpu.memory_space<vmem>>, vector<1x8x128xf32>,
      %cst_7 = arith.constant 0.000000e+00 : f32
      %13 = vector.broadcast %cst_7 : f32 to vector<1x8x128xf32>
      %c0_8 = arith.constant 0 : index
      %c0_9 = arith.constant 0 : index
      %c0_10 = arith.constant 0 : index
      %14 = vector.load %arg5[%c0_8, %c0_9, %c0_10] : memref<1x8x128xf32, #tpu.memory_space<vmem>>, vector<1x8x128xf32>
      tpu.vector_store %arg5[%c0_8, %c0_9, %c0_10], %13 {strides = array<i32>} : memref<1x8x128xf32, #tpu.memory_space<vmem>>, vector<1x8x128xf32>,
      %cst_11 = arith.constant 0.000000e+00 : f32
      %15 = vector.broadcast %cst_11 : f32 to vector<1x8x128xf32>
      %c0_12 = arith.constant 0 : index
      %c0_13 = arith.constant 0 : index
      %c0_14 = arith.constant 0 : index
      %16 = vector.load %arg6[%c0_12, %c0_13, %c0_14] : memref<1x8x128xf32, #tpu.memory_space<vmem>>, vector<1x8x128xf32>
      tpu.vector_store %arg6[%c0_12, %c0_13, %c0_14], %15 {strides = array<i32>} : memref<1x8x128xf32, #tpu.memory_space<vmem>>, vector<1x8x128xf32>,
    } else {
    }
    %c1_i32 = arith.constant 1 : i32
    %3 = arith.muli %arg0, %c1_i32 : i32
    %4 = arith.addi %3, %arg1 : i32
    %c0_i32_1 = arith.constant 0 : i32
    %5 = arith.cmpi slt, %4, %c0_i32_1 : i32
    %6 = arith.extui %5 : i1 to i32
    %c0_i32_2 = arith.constant 0 : i32
    %7 = arith.cmpi ne, %6, %c0_i32_2 : i32
    scf.if %7 {
      %cst = arith.constant 0.000000e+00 : f32
      %11 = vector.broadcast %cst : f32 to vector<8x128xf32>
      %c0_i32_5 = arith.constant 0 : i32
      %c16_i32 = arith.constant 16 : i32
      %12 = arith.muli %c0_i32_5, %c16_i32 : i32
      %13 = tpu.assume_multiple %12, 16 : i32
      %14 = arith.index_cast %13 : i32 to index
      %c0 = arith.constant 0 : index
      %15 = vector.load %arg2[%14, %c0] : memref<16x128xf32, #tpu.memory_space<vmem>>, vector<16x128xf32>
      %16 = arith.index_cast %13 : i32 to index
      %c0_6 = arith.constant 0 : index
      %17 = vector.load %arg3[%16, %c0_6] : memref<16x128xf32, #tpu.memory_space<vmem>>, vector<16x128xf32>
      %cst_7 = arith.constant 2.000000e+00 : f32
      %18 = vector.broadcast %cst_7 : f32 to vector<16x128xf32>
      %19 = arith.cmpf one, %17, %18 : vector<16x128xf32>
      %cst_8 = arith.constant 0.000000e+00 : f32
      %20 = vector.broadcast %cst_8 : f32 to vector<16x128xf32>
      %21 = arith.select %19, %15, %20 : vector<16x128xi1>, vector<16x128xf32>
      %cst_9 = arith.constant 0.000000e+00 : f32
      %22 = vector.broadcast %cst_9 : f32 to vector<16x128xf32>
      %23 = arith.select %19, %17, %22 : vector<16x128xi1>, vector<16x128xf32>
      %24 = arith.mulf %21, %23 : vector<16x128xf32>
      %25 = vector.shape_cast %24 : vector<16x128xf32> to vector<2x8x128xf32>
      %cst_10 = arith.constant dense<0.000000e+00> : vector<8x128xf32>
      %26 = vector.multi_reduction <add>, %25, %cst_10 [0] : vector<2x8x128xf32> to vector<8x128xf32>
      %27 = arith.addf %11, %26 : vector<8x128xf32>
      %28 = vector.shape_cast %21 : vector<16x128xf32> to vector<2x8x128xf32>
      %cst_11 = arith.constant dense<0.000000e+00> : vector<8x128xf32>
      %29 = vector.multi_reduction <add>, %28, %cst_11 [0] : vector<2x8x128xf32> to vector<8x128xf32>
      %30 = arith.addf %11, %29 : vector<8x128xf32>
      %31 = vector.shape_cast %23 : vector<16x128xf32> to vector<2x8x128xf32>
      %cst_12 = arith.constant dense<0.000000e+00> : vector<8x128xf32>
      %32 = vector.multi_reduction <add>, %31, %cst_12 [0] : vector<2x8x128xf32> to vector<8x128xf32>
      %33 = arith.addf %11, %32 : vector<8x128xf32>
      %c1_i32_13 = arith.constant 1 : i32
      %c0_14 = arith.constant 0 : index
      %c0_15 = arith.constant 0 : index
      %c0_16 = arith.constant 0 : index
      %34 = vector.load %arg4[%c0_14, %c0_15, %c0_16] : memref<1x8x128xf32, #tpu.memory_space<vmem>>, vector<1x8x128xf32>
      %35 = vector.shape_cast %27 : vector<8x128xf32> to vector<1x8x128xf32>
      %36 = arith.addf %34, %35 : vector<1x8x128xf32>
      %c0_17 = arith.constant 0 : index
      %c0_18 = arith.constant 0 : index
      %c0_19 = arith.constant 0 : index
      %37 = vector.load %arg4[%c0_17, %c0_18, %c0_19] : memref<1x8x128xf32, #tpu.memory_space<vmem>>, vector<1x8x128xf32>
      tpu.vector_store %arg4[%c0_17, %c0_18, %c0_19], %36 {strides = array<i32>} : memref<1x8x128xf32, #tpu.memory_space<vmem>>, vector<1x8x128xf32>,
      %c0_20 = arith.constant 0 : index
      %c0_21 = arith.constant 0 : index
      %c0_22 = arith.constant 0 : index
      %38 = vector.load %arg5[%c0_20, %c0_21, %c0_22] : memref<1x8x128xf32, #tpu.memory_space<vmem>>, vector<1x8x128xf32>
      %39 = vector.shape_cast %30 : vector<8x128xf32> to vector<1x8x128xf32>
      %40 = arith.addf %38, %39 : vector<1x8x128xf32>
      %c0_23 = arith.constant 0 : index
      %c0_24 = arith.constant 0 : index
      %c0_25 = arith.constant 0 : index
      %41 = vector.load %arg5[%c0_23, %c0_24, %c0_25] : memref<1x8x128xf32, #tpu.memory_space<vmem>>, vector<1x8x128xf32>
      tpu.vector_store %arg5[%c0_23, %c0_24, %c0_25], %40 {strides = array<i32>} : memref<1x8x128xf32, #tpu.memory_space<vmem>>, vector<1x8x128xf32>,
      %c0_26 = arith.constant 0 : index
      %c0_27 = arith.constant 0 : index
      %c0_28 = arith.constant 0 : index
      %42 = vector.load %arg6[%c0_26, %c0_27, %c0_28] : memref<1x8x128xf32, #tpu.memory_space<vmem>>, vector<1x8x128xf32>
      %43 = vector.shape_cast %33 : vector<8x128xf32> to vector<1x8x128xf32>
      %44 = arith.addf %42, %43 : vector<1x8x128xf32>
      %c0_29 = arith.constant 0 : index
      %c0_30 = arith.constant 0 : index
      %c0_31 = arith.constant 0 : index
      %45 = vector.load %arg6[%c0_29, %c0_30, %c0_31] : memref<1x8x128xf32, #tpu.memory_space<vmem>>, vector<1x8x128xf32>
      tpu.vector_store %arg6[%c0_29, %c0_30, %c0_31], %44 {strides = array<i32>} : memref<1x8x128xf32, #tpu.memory_space<vmem>>, vector<1x8x128xf32>,
    } else {
    }
    %c0_i32_3 = arith.constant 0 : i32
    %8 = arith.cmpi sge, %4, %c0_i32_3 : i32
    %9 = arith.extui %8 : i1 to i32
    %c0_i32_4 = arith.constant 0 : i32
    %10 = arith.cmpi ne, %9, %c0_i32_4 : i32
    scf.if %10 {
      %c2048_i32 = arith.constant 2048 : i32
      %11 = arith.muli %4, %c2048_i32 : i32
      %c2048_i32_5 = arith.constant 2048 : i32
      %12 = arith.subi %c2048_i32_5, %11 : i32
      %13 = tpu.iota {dimensions = array<i32: 0>} : vector<16x128xi32>
      %14 = tpu.iota {dimensions = array<i32: 1>} : vector<16x128xi32>
      %c128_i32 = arith.constant 128 : i32
      %15 = vector.broadcast %c128_i32 : i32 to vector<16x128xi32>
      %16 = arith.muli %13, %15 : vector<16x128xi32>
      %17 = arith.addi %16, %14 : vector<16x128xi32>
      %cst = arith.constant 0.000000e+00 : f32
      %18 = vector.broadcast %cst : f32 to vector<8x128xf32>
      %c0_i32_6 = arith.constant 0 : i32
      %c16_i32 = arith.constant 16 : i32
      %19 = arith.muli %c0_i32_6, %c16_i32 : i32
      %20 = tpu.assume_multiple %19, 16 : i32
      %21 = arith.index_cast %20 : i32 to index
      %c0 = arith.constant 0 : index
      %22 = vector.load %arg2[%21, %c0] : memref<16x128xf32, #tpu.memory_space<vmem>>, vector<16x128xf32>
      %23 = arith.index_cast %20 : i32 to index
      %c0_7 = arith.constant 0 : index
      %24 = vector.load %arg3[%23, %c0_7] : memref<16x128xf32, #tpu.memory_space<vmem>>, vector<16x128xf32>
      %cst_8 = arith.constant 2.000000e+00 : f32
      %25 = vector.broadcast %cst_8 : f32 to vector<16x128xf32>
      %26 = arith.cmpf one, %24, %25 : vector<16x128xf32>
      %c128_i32_9 = arith.constant 128 : i32
      %27 = arith.muli %20, %c128_i32_9 : i32
      %28 = arith.subi %12, %27 : i32
      %29 = vector.broadcast %28 : i32 to vector<16x128xi32>
      %30 = arith.cmpi slt, %17, %29 : vector<16x128xi32>
      %31 = arith.andi %26, %30 : vector<16x128xi1>
      %cst_10 = arith.constant 0.000000e+00 : f32
      %32 = vector.broadcast %cst_10 : f32 to vector<16x128xf32>
      %33 = arith.select %31, %22, %32 : vector<16x128xi1>, vector<16x128xf32>
      %cst_11 = arith.constant 0.000000e+00 : f32
      %34 = vector.broadcast %cst_11 : f32 to vector<16x128xf32>
      %35 = arith.select %31, %24, %34 : vector<16x128xi1>, vector<16x128xf32>
      %36 = arith.mulf %33, %35 : vector<16x128xf32>
      %37 = vector.shape_cast %36 : vector<16x128xf32> to vector<2x8x128xf32>
      %cst_12 = arith.constant dense<0.000000e+00> : vector<8x128xf32>
      %38 = vector.multi_reduction <add>, %37, %cst_12 [0] : vector<2x8x128xf32> to vector<8x128xf32>
      %39 = arith.addf %18, %38 : vector<8x128xf32>
      %40 = vector.shape_cast %33 : vector<16x128xf32> to vector<2x8x128xf32>
      %cst_13 = arith.constant dense<0.000000e+00> : vector<8x128xf32>
      %41 = vector.multi_reduction <add>, %40, %cst_13 [0] : vector<2x8x128xf32> to vector<8x128xf32>
      %42 = arith.addf %18, %41 : vector<8x128xf32>
      %43 = vector.shape_cast %35 : vector<16x128xf32> to vector<2x8x128xf32>
      %cst_14 = arith.constant dense<0.000000e+00> : vector<8x128xf32>
      %44 = vector.multi_reduction <add>, %43, %cst_14 [0] : vector<2x8x128xf32> to vector<8x128xf32>
      %45 = arith.addf %18, %44 : vector<8x128xf32>
      %c1_i32_15 = arith.constant 1 : i32
      %c0_16 = arith.constant 0 : index
      %c0_17 = arith.constant 0 : index
      %c0_18 = arith.constant 0 : index
      %46 = vector.load %arg4[%c0_16, %c0_17, %c0_18] : memref<1x8x128xf32, #tpu.memory_space<vmem>>, vector<1x8x128xf32>
      %47 = vector.shape_cast %39 : vector<8x128xf32> to vector<1x8x128xf32>
      %48 = arith.addf %46, %47 : vector<1x8x128xf32>
      %c0_19 = arith.constant 0 : index
      %c0_20 = arith.constant 0 : index
      %c0_21 = arith.constant 0 : index
      %49 = vector.load %arg4[%c0_19, %c0_20, %c0_21] : memref<1x8x128xf32, #tpu.memory_space<vmem>>, vector<1x8x128xf32>
      tpu.vector_store %arg4[%c0_19, %c0_20, %c0_21], %48 {strides = array<i32>} : memref<1x8x128xf32, #tpu.memory_space<vmem>>, vector<1x8x128xf32>,
      %c0_22 = arith.constant 0 : index
      %c0_23 = arith.constant 0 : index
      %c0_24 = arith.constant 0 : index
      %50 = vector.load %arg5[%c0_22, %c0_23, %c0_24] : memref<1x8x128xf32, #tpu.memory_space<vmem>>, vector<1x8x128xf32>
      %51 = vector.shape_cast %42 : vector<8x128xf32> to vector<1x8x128xf32>
      %52 = arith.addf %50, %51 : vector<1x8x128xf32>
      %c0_25 = arith.constant 0 : index
      %c0_26 = arith.constant 0 : index
      %c0_27 = arith.constant 0 : index
      %53 = vector.load %arg5[%c0_25, %c0_26, %c0_27] : memref<1x8x128xf32, #tpu.memory_space<vmem>>, vector<1x8x128xf32>
      tpu.vector_store %arg5[%c0_25, %c0_26, %c0_27], %52 {strides = array<i32>} : memref<1x8x128xf32, #tpu.memory_space<vmem>>, vector<1x8x128xf32>,
      %c0_28 = arith.constant 0 : index
      %c0_29 = arith.constant 0 : index
      %c0_30 = arith.constant 0 : index
      %54 = vector.load %arg6[%c0_28, %c0_29, %c0_30] : memref<1x8x128xf32, #tpu.memory_space<vmem>>, vector<1x8x128xf32>
      %55 = vector.shape_cast %45 : vector<8x128xf32> to vector<1x8x128xf32>
      %56 = arith.addf %54, %55 : vector<1x8x128xf32>
      %c0_31 = arith.constant 0 : index
      %c0_32 = arith.constant 0 : index
      %c0_33 = arith.constant 0 : index
      %57 = vector.load %arg6[%c0_31, %c0_32, %c0_33] : memref<1x8x128xf32, #tpu.memory_space<vmem>>, vector<1x8x128xf32>
      tpu.vector_store %arg6[%c0_31, %c0_32, %c0_33], %56 {strides = array<i32>} : memref<1x8x128xf32, #tpu.memory_space<vmem>>, vector<1x8x128xf32>,
    } else {
    }
    return
  }
  func.func @transform_0(%arg0: i32, %arg1: i32) -> (i32, i32) {
    %c1_i32 = arith.constant 1 : i32
    %0 = arith.muli %arg0, %c1_i32 : i32
    %1 = arith.addi %0, %arg1 : i32
    %c0_i32 = arith.constant 0 : i32
    %2 = arith.minsi %1, %c0_i32 : i32
    %c0_i32_0 = arith.constant 0 : i32
    %c0_i32_1 = arith.constant 0 : i32
    return %2, %c0_i32_0 : i32, i32
  }
  func.func @transform_1(%arg0: i32, %arg1: i32) -> (i32, i32) {
    %c1_i32 = arith.constant 1 : i32
    %0 = arith.muli %arg0, %c1_i32 : i32
    %1 = arith.addi %0, %arg1 : i32
    %c0_i32 = arith.constant 0 : i32
    %2 = arith.minsi %1, %c0_i32 : i32
    %c0_i32_0 = arith.constant 0 : i32
    %c0_i32_1 = arith.constant 0 : i32
    return %2, %c0_i32_0 : i32, i32
  }
  func.func @transform_2(%arg0: i32, %arg1: i32) -> (i32, i32, i32) {
    %c0_i32 = arith.constant 0 : i32
    %c0_i32_0 = arith.constant 0 : i32
    %c0_i32_1 = arith.constant 0 : i32
    return %arg0, %c0_i32, %c0_i32_0 : i32, i32, i32
  }
  func.func @transform_3(%arg0: i32, %arg1: i32) -> (i32, i32, i32) {
    %c0_i32 = arith.constant 0 : i32
    %c0_i32_0 = arith.constant 0 : i32
    %c0_i32_1 = arith.constant 0 : i32
    return %arg0, %c0_i32, %c0_i32_0 : i32, i32, i32
  }
  func.func @transform_4(%arg0: i32, %arg1: i32) -> (i32, i32, i32) {
    %c0_i32 = arith.constant 0 : i32
    %c0_i32_0 = arith.constant 0 : i32
    %c0_i32_1 = arith.constant 0 : i32
    return %arg0, %c0_i32, %c0_i32_0 : i32, i32, i32
  }
}

</mosaic_0001>

<bundles_post_ra>
// kernel: tpu_custom_call.1
= control target key start
LH: loop header
LB: loop body
LE: loop exit
PB: predicated region body
PF: predicated region fallthrough
CT: control target
= control target key end

     0   :  { %10 = vsyncpa [#allocation3], 0  ;;  %s431_s0 = inlined_call_operand.hbm [shape: f32[16,128], index: 0, kind: input, shape index: {}]   ;;  %s432_s1 = inlined_call_operand.hbm [shape: f32[16,128], index: 1, kind: input, shape index: {}]   ;;  %s433_s2 = inlined_call_operand.hbm [shape: f32[1,8,128], index: 2, kind: output, shape index: {0}]   ;;  %s434_s3 = inlined_call_operand.hbm [shape: f32[1,8,128], index: 3, kind: output, shape index: {1}]   ;;  %s435_s4 = inlined_call_operand.hbm [shape: f32[1,8,128], index: 4, kind: output, shape index: {2}]  }
   0x1   :  { %11 = vsyncpa [#allocation6], 0 }
   0x2   :  { %12 = vsyncpa [#allocation4], 0 }
   0x3   :  { %13 = vsyncpa [#allocation9], 0  ;;  %s325_s15 = smov [#allocation2]   ;;  %s207_s19 = scalar_lea.hbm %s431_s0, 256 }
   0x4   :  { %s25_s16 = sshll.u32 %s325_s15, 4  ;;  %p208_p0 = scmp.ne.s32.totalorder %s431_s0, %s207_s19  ;;  %s26_s16 = int_to_ptr.vmem [resolvable:$true] %s25_s16 }
   0x5   :  { %p211_p1 = scmp.lt.u32.totalorder %s207_s19, %s431_s0 }
   0x7   :  { %p213_p2 = pnand %p211_p1, %p208_p0 }
   0x9   :  { %216 = shalt.err (!%p213_p2)
}
   0xa   :  { %s217_s24 = scalar_lea.vmem %s26_s16, 256  ;;  %p222_p4 = scmp.lt.s32.totalorder %s26_s16, %s26_s16 }
   0xb   :  { %p218_p3 = scmp.ne.s32.totalorder %s26_s16, %s217_s24  ;;  %p223_p5 = scmp.lt.s32.totalorder %s217_s24, %s217_s24 }
   0xd   :  { %p224_p6 = por %p223_p5, %p222_p4 }
   0xf   :  { %p225_p7 = pnand %p224_p6, %p218_p3 }
  0x11   :  { %228 = shalt.err (!%p225_p7)
}
  0x12   :  { %s326_s25 = smov 128   ;;  %s327_s26 = smov 8  }
  0x13   :  { %31 = dma.hbm_to_vmem [thread:$0]  %s431_s0, 256, %s26_s16, [#allocation3], %s326_s25, %s326_s25, %s327_s26  }
  0x14   :  { %s328_s29 = smov [#allocation5]   ;;  %s229_s7 = scalar_lea.hbm %s432_s1, 256 }
  0x15   :  { %s43_s30 = sshll.u32 %s328_s29, 4  ;;  %p230_p8 = scmp.ne.s32.totalorder %s432_s1, %s229_s7  ;;  %s44_s30 = int_to_ptr.vmem [resolvable:$true] %s43_s30 }
  0x16   :  { %p233_p9 = scmp.lt.u32.totalorder %s229_s7, %s432_s1 }
  0x18   :  { %p235_p10 = pnand %p233_p9, %p230_p8 }
  0x1a   :  { %238 = shalt.err (!%p235_p10)
}
  0x1b   :  { %s239_s12 = scalar_lea.vmem %s44_s30, 256  ;;  %p244_p12 = scmp.lt.s32.totalorder %s44_s30, %s44_s30 }
  0x1c   :  { %p240_p11 = scmp.ne.s32.totalorder %s44_s30, %s239_s12  ;;  %p245_p13 = scmp.lt.s32.totalorder %s239_s12, %s239_s12 }
  0x1e   :  { %p246_p0 = por %p245_p13, %p244_p12 }
  0x20   :  { %p247_p1 = pnand %p246_p0, %p240_p11 }
  0x22   :  { %250 = shalt.err (!%p247_p1)
}
  0x23   :  { %49 = dma.hbm_to_vmem [thread:$0]  %s432_s1, 256, %s44_s30, [#allocation6], %s326_s25, %s326_s25, %s327_s26  }
  0x24   :  { %317 = dma.done.wait [#allocation3], 256  }
  0x25   :  { %318 = vsyncadd [#allocation3], 4294967040 }
  0x26   :  { %319 = dma.done.wait [#allocation6], 256  }
  0x27   :  { %320 = vsyncadd [#allocation6], 4294967040  ;;  %v109_v0 = vlaneseq  ;;  %v118_v7 = vld [vmem:[#allocation2] sm:$0xff]  ;;  %v120_v8 = vld [vmem:[#allocation5] sm:$0xff]  ;;  %s329_s1 = smov [#allocation8]   ;;  %s330_s15 = smov [#allocation10]  }
  0x28   :  { %v121_v10 = vld [vmem:[#allocation5 + $0x8] sm:$0xff]  ;;  %vm122_vm0 = vcmp.ne.f32.partialorder %v120_v8, 2.0  ;;  %v119_v11 = vld [vmem:[#allocation2 + $0x8] sm:$0xff]  ;;  %s168_s14 = sshll.u32 %s329_s1, 4  ;;  %s178_s16 = sshll.u32 %s330_s15, 4  ;;  %s169_s14 = int_to_ptr.vmem [resolvable:$true] %s168_s14  ;;  %s381_s16 = int_to_ptr.vmem [resolvable:$true] %s178_s16 }
  0x29   :  { %v110_v1 = vshrl.u32 %v109_v0, 7  ;;  %v113_v2 = vand.u32 127, %v109_v0  ;;  %vm123_vm2 = vcmp.ne.f32.partialorder %v121_v10, 2.0  ;;  %s331_s17 = smov [#allocation7]   ;;  %s251_s19 = scalar_lea.vmem %s169_s14, 128 }
  0x2a   :  { %s158_s18 = sshll.u32 %s331_s17, 4  ;;  %p252_p2 = scmp.ne.s32.totalorder %s169_s14, %s251_s19  ;;  %s383_s18 = int_to_ptr.vmem [resolvable:$true] %s158_s18 }
  0x2b   :  { %v111_v3 = vadd.s32 8, %v110_v1  ;;  %v114_v4 = vmul.u32 128, %v110_v1  ;;  %p256_p3 = scmp.lt.s32.totalorder %s169_s14, %s169_s14  ;;  %p257_p4 = scmp.lt.s32.totalorder %s251_s19, %s251_s19 }
  0x2d   :  { %v115_v5 = vmul.u32 128, %v111_v3  ;;  %v116_v6 = vadd.s32 %v114_v4, %v113_v2  ;;  %p258_p5 = por %p257_p4, %p256_p3 }
  0x2f   :  { %v117_v9 = vadd.s32 %v115_v5, %v113_v2  ;;  %vm127_vm1 = vcmp.lt.s32.totalorder %v116_v6, 2048  ;;  %p259_p6 = pnand %p258_p5, %p252_p2 }
  0x30   :  { %vm129_vm3 = vmand %vm122_vm0, %vm127_vm1 }
  0x31   :  { %vm128_vm4 = vcmp.lt.s32.totalorder %v117_v9, 2048  ;;  %v131_v12 = vsel %vm129_vm3, %v118_v7, 0.0  ;;  %v133_v13 = vsel %vm129_vm3, %v120_v8, 0.0 }
  0x32   :  { %vm130_vm5 = vmand %vm123_vm2, %vm128_vm4  ;;  %v135_v14 = vmul.f32 %v133_v13, %v131_v12 }
  0x33   :  { %v132_v15 = vsel %vm130_vm5, %v119_v11, 0.0  ;;  %v134_v16 = vsel %vm130_vm5, %v121_v10, 0.0 }
  0x34   :  { %v139_v17 = vadd.f32 %v132_v15, %v131_v12  ;;  %v136_v18 = vmul.f32 %v134_v16, %v132_v15  ;;  %v141_v19 = vadd.f32 %v134_v16, %v133_v13 }
  0x36   :  { %v137_v20 = vadd.f32 %v136_v18, %v135_v14  ;;  %148 = vst [vmem:[#allocation8] sm:$0xff] %v139_v17  ;;  %151 = vst [vmem:[#allocation10] sm:$0xff] %v141_v19 }
  0x37   :  { %262 = shalt.err (!%p259_p6)
}
  0x38   :  { %s263_s22 = scalar_lea.hbm %s434_s3, 128 }
  0x39   :  { %p264_p7 = scmp.ne.s32.totalorder %s434_s3, %s263_s22  ;;  %p267_p8 = scmp.lt.u32.totalorder %s263_s22, %s434_s3 }
  0x3b   :  { %p269_p9 = pnand %p267_p8, %p264_p7 }
  0x3d   :  { %272 = shalt.err (!%p269_p9)
}
  0x3e   :  { %171 = dma.vmem_to_hbm [thread:$0]  %s169_s14, 128, %s434_s3, [#allocation9]   ;;  %145 = vst [vmem:[#allocation7] sm:$0xff] %v137_v20 }
  0x3f   :  { %s273_s29 = scalar_lea.vmem %s381_s16, 128  ;;  %p278_p11 = scmp.lt.s32.totalorder %s381_s16, %s381_s16 }
  0x40   :  { %p274_p10 = scmp.ne.s32.totalorder %s381_s16, %s273_s29  ;;  %p279_p12 = scmp.lt.s32.totalorder %s273_s29, %s273_s29 }
  0x42   :  { %p280_p13 = por %p279_p12, %p278_p11 }
  0x44   :  { %p281_p0 = pnand %p280_p13, %p274_p10 }
  0x46   :  { %284 = shalt.err (!%p281_p0)
}
  0x47   :  { %s285_s6 = scalar_lea.hbm %s435_s4, 128 }
  0x48   :  { %p286_p1 = scmp.ne.s32.totalorder %s435_s4, %s285_s6  ;;  %p289_p2 = scmp.lt.u32.totalorder %s285_s6, %s435_s4 }
  0x4a   :  { %p291_p3 = pnand %p289_p2, %p286_p1 }
  0x4c   :  { %294 = shalt.err (!%p291_p3)
}
  0x4d   :  { %181 = dma.vmem_to_hbm [thread:$0]  %s381_s16, 128, %s435_s4, [#allocation9]  }
  0x4e   :  { %s295_s12 = scalar_lea.vmem %s383_s18, 128  ;;  %p300_p5 = scmp.lt.s32.totalorder %s383_s18, %s383_s18 }
  0x4f   :  { %p296_p4 = scmp.ne.s32.totalorder %s383_s18, %s295_s12  ;;  %p301_p6 = scmp.lt.s32.totalorder %s295_s12, %s295_s12 }
  0x51   :  { %p302_p7 = por %p301_p6, %p300_p5 }
  0x53   :  { %p303_p8 = pnand %p302_p7, %p296_p4 }
  0x55   :  { %306 = shalt.err (!%p303_p8)
}
  0x56   :  { %s307_s1 = scalar_lea.hbm %s433_s2, 128 }
  0x57   :  { %p308_p9 = scmp.ne.s32.totalorder %s433_s2, %s307_s1  ;;  %p311_p10 = scmp.lt.u32.totalorder %s307_s1, %s433_s2 }
  0x59   :  { %p313_p11 = pnand %p311_p10, %p308_p9 }
  0x5b   :  { %316 = shalt.err (!%p313_p11)
}
  0x5c   :  { %161 = dma.vmem_to_hbm [thread:$0]  %s383_s18, 128, %s433_s2, [#allocation4]  }
  0x5d   :  { %321 = dma.done.wait [#allocation4], 128  }
  0x5e   :  { %322 = vsyncadd [#allocation4], 4294967168 }
  0x5f   :  { %323 = dma.done.wait [#allocation9], 256  }
  0x60   :  { %324 = vsyncadd [#allocation9], 4294967040 }
  0x61   :  { %191 = vsyncpa [#allocation3], 1 }
  0x62   :  { %192 = vsyncpa [#allocation6], 1 }
  0x63   :  { %193 = vsyncpa [#allocation4], 1 }
  0x64   :  { %194 = vsyncpa [#allocation9], 1 }

</bundles_post_ra>
